<compile_context>
chip_gen: v7x
topology: tpu7x:2x2x1
jax: 0.10.0
libtpu: 0.0.40
codegen_flags: <defaults>
</compile_context>

<pallas_src>
import math

import jax
import jax.numpy as jnp
import numpy as np
from jax.experimental import pallas as pl
from jax.experimental.pallas import tpu as pltpu


def _round_up(a, b):
    return (a + b - 1) // b * b


def make_posterior_fn(W, V, u, b, weight_dtype=jnp.bfloat16):
    """Pack the per-relation parameters once and return jitted apply fns.

    W: (R, S, E, E)  bilinear weights      V: (R, S, E)  linear weights
    u: (R, S)        slice-mixing weights  b: (R, S)     biases
    Returns (single_fn, batched_fn):
      single_fn(x: (E,))  -> (R,)   probabilities (module forward semantics)
      batched_fn(X: (B,E)) -> (B,R) probabilities
    """
    R, S, E, _ = W.shape
    # Pad slice_dim so the hidden axis (R * S_pad) is a multiple of 128 lanes.
    S_pad = _round_up(S, 128 // math.gcd(R, 128))
    C = R * S_pad  # lane-dense hidden width (c = r*S_pad + s)

    # ---- one-time parameter packing --------------------------------------
    Wp = jnp.pad(jnp.asarray(W, jnp.float32),
                 ((0, 0), (0, S_pad - S), (0, 0), (0, 0)))
    # W1[i, j*C + c] = W[r, s, i, j]
    W1 = Wp.transpose(2, 3, 0, 1).reshape(E, E * C).astype(weight_dtype)
    Vp = jnp.pad(jnp.asarray(V, jnp.float32), ((0, 0), (0, S_pad - S), (0, 0)))
    Vt = Vp.transpose(2, 0, 1).reshape(E, C)               # Vt[e, c] = V[r, s, e]
    bp = jnp.pad(jnp.asarray(b, jnp.float32), ((0, 0), (0, S_pad - S))).reshape(1, C)
    Vt_aug = jnp.concatenate([Vt, bp], axis=0).astype(weight_dtype)   # (E+1, C)
    u_pad = jnp.pad(jnp.asarray(u, jnp.float32), ((0, 0), (0, S_pad - S))).reshape(1, C)

    def kernel(x_ref, w1_ref, vt_ref, u_ref, out_ref, a_ref):
        x_aug = x_ref[...]                                    # (Bt, E+1) f32
        x = x_aug[:, :E]                                      # (Bt, E)
        # Bilinear stage 1 (MXU): A[b, j*C + c] = sum_i x[b,i] * W[c, i, j]
        a_ref[...] = jnp.dot(x.astype(weight_dtype), w1_ref[...],
                             preferred_element_type=jnp.float32)
        # Bilinear stage 2 (VPU, 128-lane-aligned slices):
        #   hb[b, c] = sum_j x[b, j] * A[b, j*C + c]  ==  x^T W_c x
        hb = x[:, 0:1] * a_ref[:, 0:C]
        for j in range(1, E):
            hb = hb + x[:, j:j + 1] * a_ref[:, j * C:(j + 1) * C]
        # Linear term + bias (bias folded via the trailing 1.0 column of x_aug).
        hv = jnp.dot(x_aug.astype(weight_dtype), vt_ref[...],
                     preferred_element_type=jnp.float32)      # (Bt, C)
        h = jnp.tanh(hb + hv)                                 # f32 (v5e-safe)
        uh = u_ref[...] * h                                   # (Bt, C)
        # Per-relation sum over the (padded) slice dim; padded slices have u == 0.
        scores = jnp.concatenate(
            [jnp.sum(uh[:, r * S_pad:(r + 1) * S_pad], axis=-1, keepdims=True)
             for r in range(R)], axis=-1)                     # (Bt, R)
        out_ref[...] = jax.nn.sigmoid(scores)

    @jax.jit
    def batched_fn(xb):
        B = xb.shape[0]
        Bt = min(128, _round_up(B, 8))        # batch tile: multiple of 8 sublanes
        B_pad = _round_up(B, Bt)
        x_aug = jnp.concatenate(
            [xb.astype(jnp.float32), jnp.ones((B, 1), jnp.float32)], axis=-1)
        x_aug = jnp.pad(x_aug, ((0, B_pad - B), (0, 0)))
        out = pl.pallas_call(
            kernel,
            grid=(B_pad // Bt,),
            in_specs=[
                pl.BlockSpec((Bt, E + 1), lambda i: (i, 0)),   # embeddings (tiled)
                pl.BlockSpec((E, E * C), lambda i: (0, 0)),    # W1: VMEM-resident
                pl.BlockSpec((E + 1, C), lambda i: (0, 0)),    # V|b: VMEM-resident
                pl.BlockSpec((1, C), lambda i: (0, 0)),        # u : VMEM-resident
            ],
            out_specs=pl.BlockSpec((Bt, R), lambda i: (i, 0)),
            out_shape=jax.ShapeDtypeStruct((B_pad, R), jnp.float32),
            scratch_shapes=[pltpu.VMEM((Bt, E * C), jnp.float32)],
            compiler_params=pltpu.CompilerParams(
                dimension_semantics=("parallel",)),
        )(x_aug, W1, Vt_aug, u_pad)
        return out[:B]

    def single_fn(x):
        # Mirrors Posterior.forward inference branch: one node embedding -> (R,) probs.
        return batched_fn(x[None, :])[0]

    return single_fn, batched_fn


def posterior_ref(x, W, V, u, b):
    """Pure-JAX reference mirroring the PyTorch compute_atom_pb math."""
    hb = jnp.einsum('i,rsij,j->rs', x, W, x)
    hv = jnp.einsum('rse,e->rs', V, x)
    h = jnp.tanh(hb + hv + b)
    score = jnp.sum(u * h, axis=-1)
    return jax.nn.sigmoid(score)


if __name__ == "__main__":
    key = jax.random.PRNGKey(0)
    E, S = 32, 8                  # embed_dim, slice_dim
    num_rels = 8                  # total relations (rel2id size)
    attr_id_list = [4, 5, 6, 7]   # mirrors generate_attribute(): attribute relation ids
    R = len(attr_id_list)
    B = 40                        # batch of node embeddings for the batched path

    k1, k2, k3, k4, k5, k6 = jax.random.split(key, 6)
    # deterministic synthetic parameters (shapes per Posterior.__init__)
    W_all = jax.random.normal(k1, (num_rels, S, E, E), jnp.float32) * (1.0 / E)
    V_all = jax.random.normal(k2, (num_rels, S, E), jnp.float32) * (1.0 / jnp.sqrt(E))
    u_all = jax.random.normal(k3, (num_rels, S), jnp.float32)
    b_all = jax.random.normal(k4, (num_rels, S), jnp.float32)
    x = jax.random.normal(k5, (E,), jnp.float32)      # single node embedding
    X = jax.random.normal(k6, (B, E), jnp.float32)    # batch of node embeddings

    idx = jnp.array(attr_id_list)
    W, V, u, b = W_all[idx], V_all[idx], u_all[idx], b_all[idx]

    # one-time packing; per-call path is jitted and weight-layout-free
    single_fn, batched_fn = make_posterior_fn(W, V, u, b)

    # single-embedding path (module forward semantics)
    probs = jax.block_until_ready(single_fn(x))
    ref = posterior_ref(x, W, V, u, b)
    assert probs.shape == (R,)
    np.testing.assert_allclose(np.asarray(probs), np.asarray(ref), atol=2e-2, rtol=2e-2)

    # batched path (weights stay resident in VMEM across the batch grid)
    probs_b = jax.block_until_ready(batched_fn(X))
    ref_b = jax.vmap(lambda xe: posterior_ref(xe, W, V, u, b))(X)
    assert probs_b.shape == (B, R)
    np.testing.assert_allclose(np.asarray(probs_b), np.asarray(ref_b), atol=2e-2, rtol=2e-2)

    print("KERNEL_OK")
</pallas_src>

<mosaic_0001>
module attributes {stable_mosaic.version = 11 : i64} {
  func.func @kernel(%arg0: i32, %arg1: memref<8x33xf32, #tpu.memory_space<vmem>>, %arg2: memref<32x4096xbf16, #tpu.memory_space<vmem>>, %arg3: memref<33x128xbf16, #tpu.memory_space<vmem>>, %arg4: memref<1x128xf32, #tpu.memory_space<vmem>>, %arg5: memref<8x4xf32, #tpu.memory_space<vmem>>, %arg6: memref<8x4096xf32, #tpu.memory_space<vmem>>) attributes {dimension_semantics = [#tpu.dimension_semantics<parallel>], iteration_bounds = array<i64: 1>, scalar_prefetch = 0 : i64, scratch_operands = 1 : i64, tpu.core_type = #tpu.core_type<tc>, window_params = [{transform_indices = @transform_0, window_bounds = array<i64: 8, 33>}, {pipeline_mode = #tpu.pipeline_mode<synchronous>, transform_indices = @transform_1, window_bounds = array<i64: 32, 4096>}, {pipeline_mode = #tpu.pipeline_mode<synchronous>, transform_indices = @transform_2, window_bounds = array<i64: 33, 128>}, {pipeline_mode = #tpu.pipeline_mode<synchronous>, transform_indices = @transform_3, window_bounds = array<i64: 1, 128>}, {transform_indices = @transform_4, window_bounds = array<i64: 8, 4>}]} {
    %c0 = arith.constant 0 : index
    %c0_0 = arith.constant 0 : index
    %0 = vector.load %arg1[%c0, %c0_0] : memref<8x33xf32, #tpu.memory_space<vmem>>, vector<8x33xf32>
    %1 = vector.extract_strided_slice %0 {offsets = [0, 0], sizes = [8, 32], strides = [1, 1]} : vector<8x33xf32> to vector<8x32xf32>
    %2 = arith.truncf %1 : vector<8x32xf32> to vector<8x32xbf16>
    %c0_1 = arith.constant 0 : index
    %c0_2 = arith.constant 0 : index
    %3 = vector.load %arg2[%c0_1, %c0_2] : memref<32x4096xbf16, #tpu.memory_space<vmem>>, vector<32x4096xbf16>
    %cst = arith.constant dense<0.000000e+00> : vector<8x4096xf32>
    %4 = tpu.matmul %2, %3, %cst {dimension_numbers = #tpu.dot_dimension_numbers<[1], [0], [0], [1], [0, 0, 1, 1], [], []>} : vector<8x32xbf16>, vector<32x4096xbf16>, vector<8x4096xf32> -> vector<8x4096xf32>
    %c0_3 = arith.constant 0 : index
    %c0_4 = arith.constant 0 : index
    %5 = vector.load %arg6[%c0_3, %c0_4] : memref<8x4096xf32, #tpu.memory_space<vmem>>, vector<8x4096xf32>
    tpu.vector_store %arg6[%c0_3, %c0_4], %4 {strides = array<i32>} : memref<8x4096xf32, #tpu.memory_space<vmem>>, vector<8x4096xf32>,
    %6 = vector.extract_strided_slice %1 {offsets = [0, 0], sizes = [8, 1], strides = [1, 1]} : vector<8x32xf32> to vector<8x1xf32>
    %c0_5 = arith.constant 0 : index
    %c0_6 = arith.constant 0 : index
    %7 = vector.load %arg6[%c0_5, %c0_6] : memref<8x4096xf32, #tpu.memory_space<vmem>>, vector<8x128xf32>
    %8 = vector.broadcast %6 : vector<8x1xf32> to vector<8x128xf32>
    %9 = arith.mulf %8, %7 : vector<8x128xf32>
    %10 = vector.extract_strided_slice %1 {offsets = [0, 1], sizes = [8, 1], strides = [1, 1]} : vector<8x32xf32> to vector<8x1xf32>
    %c0_7 = arith.constant 0 : index
    %c128 = arith.constant 128 : index
    %11 = vector.load %arg6[%c0_7, %c128] : memref<8x4096xf32, #tpu.memory_space<vmem>>, vector<8x128xf32>
    %12 = vector.broadcast %10 : vector<8x1xf32> to vector<8x128xf32>
    %13 = arith.mulf %12, %11 : vector<8x128xf32>
    %14 = arith.addf %9, %13 : vector<8x128xf32>
    %15 = vector.extract_strided_slice %1 {offsets = [0, 2], sizes = [8, 1], strides = [1, 1]} : vector<8x32xf32> to vector<8x1xf32>
    %c0_8 = arith.constant 0 : index
    %c256 = arith.constant 256 : index
    %16 = vector.load %arg6[%c0_8, %c256] : memref<8x4096xf32, #tpu.memory_space<vmem>>, vector<8x128xf32>
    %17 = vector.broadcast %15 : vector<8x1xf32> to vector<8x128xf32>
    %18 = arith.mulf %17, %16 : vector<8x128xf32>
    %19 = arith.addf %14, %18 : vector<8x128xf32>
    %20 = vector.extract_strided_slice %1 {offsets = [0, 3], sizes = [8, 1], strides = [1, 1]} : vector<8x32xf32> to vector<8x1xf32>
    %c0_9 = arith.constant 0 : index
    %c384 = arith.constant 384 : index
    %21 = vector.load %arg6[%c0_9, %c384] : memref<8x4096xf32, #tpu.memory_space<vmem>>, vector<8x128xf32>
    %22 = vector.broadcast %20 : vector<8x1xf32> to vector<8x128xf32>
    %23 = arith.mulf %22, %21 : vector<8x128xf32>
    %24 = arith.addf %19, %23 : vector<8x128xf32>
    %25 = vector.extract_strided_slice %1 {offsets = [0, 4], sizes = [8, 1], strides = [1, 1]} : vector<8x32xf32> to vector<8x1xf32>
    %c0_10 = arith.constant 0 : index
    %c512 = arith.constant 512 : index
    %26 = vector.load %arg6[%c0_10, %c512] : memref<8x4096xf32, #tpu.memory_space<vmem>>, vector<8x128xf32>
    %27 = vector.broadcast %25 : vector<8x1xf32> to vector<8x128xf32>
    %28 = arith.mulf %27, %26 : vector<8x128xf32>
    %29 = arith.addf %24, %28 : vector<8x128xf32>
    %30 = vector.extract_strided_slice %1 {offsets = [0, 5], sizes = [8, 1], strides = [1, 1]} : vector<8x32xf32> to vector<8x1xf32>
    %c0_11 = arith.constant 0 : index
    %c640 = arith.constant 640 : index
    %31 = vector.load %arg6[%c0_11, %c640] : memref<8x4096xf32, #tpu.memory_space<vmem>>, vector<8x128xf32>
    %32 = vector.broadcast %30 : vector<8x1xf32> to vector<8x128xf32>
    %33 = arith.mulf %32, %31 : vector<8x128xf32>
    %34 = arith.addf %29, %33 : vector<8x128xf32>
    %35 = vector.extract_strided_slice %1 {offsets = [0, 6], sizes = [8, 1], strides = [1, 1]} : vector<8x32xf32> to vector<8x1xf32>
    %c0_12 = arith.constant 0 : index
    %c768 = arith.constant 768 : index
    %36 = vector.load %arg6[%c0_12, %c768] : memref<8x4096xf32, #tpu.memory_space<vmem>>, vector<8x128xf32>
    %37 = vector.broadcast %35 : vector<8x1xf32> to vector<8x128xf32>
    %38 = arith.mulf %37, %36 : vector<8x128xf32>
    %39 = arith.addf %34, %38 : vector<8x128xf32>
    %40 = vector.extract_strided_slice %1 {offsets = [0, 7], sizes = [8, 1], strides = [1, 1]} : vector<8x32xf32> to vector<8x1xf32>
    %c0_13 = arith.constant 0 : index
    %c896 = arith.constant 896 : index
    %41 = vector.load %arg6[%c0_13, %c896] : memref<8x4096xf32, #tpu.memory_space<vmem>>, vector<8x128xf32>
    %42 = vector.broadcast %40 : vector<8x1xf32> to vector<8x128xf32>
    %43 = arith.mulf %42, %41 : vector<8x128xf32>
    %44 = arith.addf %39, %43 : vector<8x128xf32>
    %45 = vector.extract_strided_slice %1 {offsets = [0, 8], sizes = [8, 1], strides = [1, 1]} : vector<8x32xf32> to vector<8x1xf32>
    %c0_14 = arith.constant 0 : index
    %c1024 = arith.constant 1024 : index
    %46 = vector.load %arg6[%c0_14, %c1024] : memref<8x4096xf32, #tpu.memory_space<vmem>>, vector<8x128xf32>
    %47 = vector.broadcast %45 : vector<8x1xf32> to vector<8x128xf32>
    %48 = arith.mulf %47, %46 : vector<8x128xf32>
    %49 = arith.addf %44, %48 : vector<8x128xf32>
    %50 = vector.extract_strided_slice %1 {offsets = [0, 9], sizes = [8, 1], strides = [1, 1]} : vector<8x32xf32> to vector<8x1xf32>
    %c0_15 = arith.constant 0 : index
    %c1152 = arith.constant 1152 : index
    %51 = vector.load %arg6[%c0_15, %c1152] : memref<8x4096xf32, #tpu.memory_space<vmem>>, vector<8x128xf32>
    %52 = vector.broadcast %50 : vector<8x1xf32> to vector<8x128xf32>
    %53 = arith.mulf %52, %51 : vector<8x128xf32>
    %54 = arith.addf %49, %53 : vector<8x128xf32>
    %55 = vector.extract_strided_slice %1 {offsets = [0, 10], sizes = [8, 1], strides = [1, 1]} : vector<8x32xf32> to vector<8x1xf32>
    %c0_16 = arith.constant 0 : index
    %c1280 = arith.constant 1280 : index
    %56 = vector.load %arg6[%c0_16, %c1280] : memref<8x4096xf32, #tpu.memory_space<vmem>>, vector<8x128xf32>
    %57 = vector.broadcast %55 : vector<8x1xf32> to vector<8x128xf32>
    %58 = arith.mulf %57, %56 : vector<8x128xf32>
    %59 = arith.addf %54, %58 : vector<8x128xf32>
    %60 = vector.extract_strided_slice %1 {offsets = [0, 11], sizes = [8, 1], strides = [1, 1]} : vector<8x32xf32> to vector<8x1xf32>
    %c0_17 = arith.constant 0 : index
    %c1408 = arith.constant 1408 : index
    %61 = vector.load %arg6[%c0_17, %c1408] : memref<8x4096xf32, #tpu.memory_space<vmem>>, vector<8x128xf32>
    %62 = vector.broadcast %60 : vector<8x1xf32> to vector<8x128xf32>
    %63 = arith.mulf %62, %61 : vector<8x128xf32>
    %64 = arith.addf %59, %63 : vector<8x128xf32>
    %65 = vector.extract_strided_slice %1 {offsets = [0, 12], sizes = [8, 1], strides = [1, 1]} : vector<8x32xf32> to vector<8x1xf32>
    %c0_18 = arith.constant 0 : index
    %c1536 = arith.constant 1536 : index
    %66 = vector.load %arg6[%c0_18, %c1536] : memref<8x4096xf32, #tpu.memory_space<vmem>>, vector<8x128xf32>
    %67 = vector.broadcast %65 : vector<8x1xf32> to vector<8x128xf32>
    %68 = arith.mulf %67, %66 : vector<8x128xf32>
    %69 = arith.addf %64, %68 : vector<8x128xf32>
    %70 = vector.extract_strided_slice %1 {offsets = [0, 13], sizes = [8, 1], strides = [1, 1]} : vector<8x32xf32> to vector<8x1xf32>
    %c0_19 = arith.constant 0 : index
    %c1664 = arith.constant 1664 : index
    %71 = vector.load %arg6[%c0_19, %c1664] : memref<8x4096xf32, #tpu.memory_space<vmem>>, vector<8x128xf32>
    %72 = vector.broadcast %70 : vector<8x1xf32> to vector<8x128xf32>
    %73 = arith.mulf %72, %71 : vector<8x128xf32>
    %74 = arith.addf %69, %73 : vector<8x128xf32>
    %75 = vector.extract_strided_slice %1 {offsets = [0, 14], sizes = [8, 1], strides = [1, 1]} : vector<8x32xf32> to vector<8x1xf32>
    %c0_20 = arith.constant 0 : index
    %c1792 = arith.constant 1792 : index
    %76 = vector.load %arg6[%c0_20, %c1792] : memref<8x4096xf32, #tpu.memory_space<vmem>>, vector<8x128xf32>
    %77 = vector.broadcast %75 : vector<8x1xf32> to vector<8x128xf32>
    %78 = arith.mulf %77, %76 : vector<8x128xf32>
    %79 = arith.addf %74, %78 : vector<8x128xf32>
    %80 = vector.extract_strided_slice %1 {offsets = [0, 15], sizes = [8, 1], strides = [1, 1]} : vector<8x32xf32> to vector<8x1xf32>
    %c0_21 = arith.constant 0 : index
    %c1920 = arith.constant 1920 : index
    %81 = vector.load %arg6[%c0_21, %c1920] : memref<8x4096xf32, #tpu.memory_space<vmem>>, vector<8x128xf32>
    %82 = vector.broadcast %80 : vector<8x1xf32> to vector<8x128xf32>
    %83 = arith.mulf %82, %81 : vector<8x128xf32>
    %84 = arith.addf %79, %83 : vector<8x128xf32>
    %85 = vector.extract_strided_slice %1 {offsets = [0, 16], sizes = [8, 1], strides = [1, 1]} : vector<8x32xf32> to vector<8x1xf32>
    %c0_22 = arith.constant 0 : index
    %c2048 = arith.constant 2048 : index
    %86 = vector.load %arg6[%c0_22, %c2048] : memref<8x4096xf32, #tpu.memory_space<vmem>>, vector<8x128xf32>
    %87 = vector.broadcast %85 : vector<8x1xf32> to vector<8x128xf32>
    %88 = arith.mulf %87, %86 : vector<8x128xf32>
    %89 = arith.addf %84, %88 : vector<8x128xf32>
    %90 = vector.extract_strided_slice %1 {offsets = [0, 17], sizes = [8, 1], strides = [1, 1]} : vector<8x32xf32> to vector<8x1xf32>
    %c0_23 = arith.constant 0 : index
    %c2176 = arith.constant 2176 : index
    %91 = vector.load %arg6[%c0_23, %c2176] : memref<8x4096xf32, #tpu.memory_space<vmem>>, vector<8x128xf32>
    %92 = vector.broadcast %90 : vector<8x1xf32> to vector<8x128xf32>
    %93 = arith.mulf %92, %91 : vector<8x128xf32>
    %94 = arith.addf %89, %93 : vector<8x128xf32>
    %95 = vector.extract_strided_slice %1 {offsets = [0, 18], sizes = [8, 1], strides = [1, 1]} : vector<8x32xf32> to vector<8x1xf32>
    %c0_24 = arith.constant 0 : index
    %c2304 = arith.constant 2304 : index
    %96 = vector.load %arg6[%c0_24, %c2304] : memref<8x4096xf32, #tpu.memory_space<vmem>>, vector<8x128xf32>
    %97 = vector.broadcast %95 : vector<8x1xf32> to vector<8x128xf32>
    %98 = arith.mulf %97, %96 : vector<8x128xf32>
    %99 = arith.addf %94, %98 : vector<8x128xf32>
    %100 = vector.extract_strided_slice %1 {offsets = [0, 19], sizes = [8, 1], strides = [1, 1]} : vector<8x32xf32> to vector<8x1xf32>
    %c0_25 = arith.constant 0 : index
    %c2432 = arith.constant 2432 : index
    %101 = vector.load %arg6[%c0_25, %c2432] : memref<8x4096xf32, #tpu.memory_space<vmem>>, vector<8x128xf32>
    %102 = vector.broadcast %100 : vector<8x1xf32> to vector<8x128xf32>
    %103 = arith.mulf %102, %101 : vector<8x128xf32>
    %104 = arith.addf %99, %103 : vector<8x128xf32>
    %105 = vector.extract_strided_slice %1 {offsets = [0, 20], sizes = [8, 1], strides = [1, 1]} : vector<8x32xf32> to vector<8x1xf32>
    %c0_26 = arith.constant 0 : index
    %c2560 = arith.constant 2560 : index
    %106 = vector.load %arg6[%c0_26, %c2560] : memref<8x4096xf32, #tpu.memory_space<vmem>>, vector<8x128xf32>
    %107 = vector.broadcast %105 : vector<8x1xf32> to vector<8x128xf32>
    %108 = arith.mulf %107, %106 : vector<8x128xf32>
    %109 = arith.addf %104, %108 : vector<8x128xf32>
    %110 = vector.extract_strided_slice %1 {offsets = [0, 21], sizes = [8, 1], strides = [1, 1]} : vector<8x32xf32> to vector<8x1xf32>
    %c0_27 = arith.constant 0 : index
    %c2688 = arith.constant 2688 : index
    %111 = vector.load %arg6[%c0_27, %c2688] : memref<8x4096xf32, #tpu.memory_space<vmem>>, vector<8x128xf32>
    %112 = vector.broadcast %110 : vector<8x1xf32> to vector<8x128xf32>
    %113 = arith.mulf %112, %111 : vector<8x128xf32>
    %114 = arith.addf %109, %113 : vector<8x128xf32>
    %115 = vector.extract_strided_slice %1 {offsets = [0, 22], sizes = [8, 1], strides = [1, 1]} : vector<8x32xf32> to vector<8x1xf32>
    %c0_28 = arith.constant 0 : index
    %c2816 = arith.constant 2816 : index
    %116 = vector.load %arg6[%c0_28, %c2816] : memref<8x4096xf32, #tpu.memory_space<vmem>>, vector<8x128xf32>
    %117 = vector.broadcast %115 : vector<8x1xf32> to vector<8x128xf32>
    %118 = arith.mulf %117, %116 : vector<8x128xf32>
    %119 = arith.addf %114, %118 : vector<8x128xf32>
    %120 = vector.extract_strided_slice %1 {offsets = [0, 23], sizes = [8, 1], strides = [1, 1]} : vector<8x32xf32> to vector<8x1xf32>
    %c0_29 = arith.constant 0 : index
    %c2944 = arith.constant 2944 : index
    %121 = vector.load %arg6[%c0_29, %c2944] : memref<8x4096xf32, #tpu.memory_space<vmem>>, vector<8x128xf32>
    %122 = vector.broadcast %120 : vector<8x1xf32> to vector<8x128xf32>
    %123 = arith.mulf %122, %121 : vector<8x128xf32>
    %124 = arith.addf %119, %123 : vector<8x128xf32>
    %125 = vector.extract_strided_slice %1 {offsets = [0, 24], sizes = [8, 1], strides = [1, 1]} : vector<8x32xf32> to vector<8x1xf32>
    %c0_30 = arith.constant 0 : index
    %c3072 = arith.constant 3072 : index
    %126 = vector.load %arg6[%c0_30, %c3072] : memref<8x4096xf32, #tpu.memory_space<vmem>>, vector<8x128xf32>
    %127 = vector.broadcast %125 : vector<8x1xf32> to vector<8x128xf32>
    %128 = arith.mulf %127, %126 : vector<8x128xf32>
    %129 = arith.addf %124, %128 : vector<8x128xf32>
    %130 = vector.extract_strided_slice %1 {offsets = [0, 25], sizes = [8, 1], strides = [1, 1]} : vector<8x32xf32> to vector<8x1xf32>
    %c0_31 = arith.constant 0 : index
    %c3200 = arith.constant 3200 : index
    %131 = vector.load %arg6[%c0_31, %c3200] : memref<8x4096xf32, #tpu.memory_space<vmem>>, vector<8x128xf32>
    %132 = vector.broadcast %130 : vector<8x1xf32> to vector<8x128xf32>
    %133 = arith.mulf %132, %131 : vector<8x128xf32>
    %134 = arith.addf %129, %133 : vector<8x128xf32>
    %135 = vector.extract_strided_slice %1 {offsets = [0, 26], sizes = [8, 1], strides = [1, 1]} : vector<8x32xf32> to vector<8x1xf32>
    %c0_32 = arith.constant 0 : index
    %c3328 = arith.constant 3328 : index
    %136 = vector.load %arg6[%c0_32, %c3328] : memref<8x4096xf32, #tpu.memory_space<vmem>>, vector<8x128xf32>
    %137 = vector.broadcast %135 : vector<8x1xf32> to vector<8x128xf32>
    %138 = arith.mulf %137, %136 : vector<8x128xf32>
    %139 = arith.addf %134, %138 : vector<8x128xf32>
    %140 = vector.extract_strided_slice %1 {offsets = [0, 27], sizes = [8, 1], strides = [1, 1]} : vector<8x32xf32> to vector<8x1xf32>
    %c0_33 = arith.constant 0 : index
    %c3456 = arith.constant 3456 : index
    %141 = vector.load %arg6[%c0_33, %c3456] : memref<8x4096xf32, #tpu.memory_space<vmem>>, vector<8x128xf32>
    %142 = vector.broadcast %140 : vector<8x1xf32> to vector<8x128xf32>
    %143 = arith.mulf %142, %141 : vector<8x128xf32>
    %144 = arith.addf %139, %143 : vector<8x128xf32>
    %145 = vector.extract_strided_slice %1 {offsets = [0, 28], sizes = [8, 1], strides = [1, 1]} : vector<8x32xf32> to vector<8x1xf32>
    %c0_34 = arith.constant 0 : index
    %c3584 = arith.constant 3584 : index
    %146 = vector.load %arg6[%c0_34, %c3584] : memref<8x4096xf32, #tpu.memory_space<vmem>>, vector<8x128xf32>
    %147 = vector.broadcast %145 : vector<8x1xf32> to vector<8x128xf32>
    %148 = arith.mulf %147, %146 : vector<8x128xf32>
    %149 = arith.addf %144, %148 : vector<8x128xf32>
    %150 = vector.extract_strided_slice %1 {offsets = [0, 29], sizes = [8, 1], strides = [1, 1]} : vector<8x32xf32> to vector<8x1xf32>
    %c0_35 = arith.constant 0 : index
    %c3712 = arith.constant 3712 : index
    %151 = vector.load %arg6[%c0_35, %c3712] : memref<8x4096xf32, #tpu.memory_space<vmem>>, vector<8x128xf32>
    %152 = vector.broadcast %150 : vector<8x1xf32> to vector<8x128xf32>
    %153 = arith.mulf %152, %151 : vector<8x128xf32>
    %154 = arith.addf %149, %153 : vector<8x128xf32>
    %155 = vector.extract_strided_slice %1 {offsets = [0, 30], sizes = [8, 1], strides = [1, 1]} : vector<8x32xf32> to vector<8x1xf32>
    %c0_36 = arith.constant 0 : index
    %c3840 = arith.constant 3840 : index
    %156 = vector.load %arg6[%c0_36, %c3840] : memref<8x4096xf32, #tpu.memory_space<vmem>>, vector<8x128xf32>
    %157 = vector.broadcast %155 : vector<8x1xf32> to vector<8x128xf32>
    %158 = arith.mulf %157, %156 : vector<8x128xf32>
    %159 = arith.addf %154, %158 : vector<8x128xf32>
    %160 = vector.extract_strided_slice %1 {offsets = [0, 31], sizes = [8, 1], strides = [1, 1]} : vector<8x32xf32> to vector<8x1xf32>
    %c0_37 = arith.constant 0 : index
    %c3968 = arith.constant 3968 : index
    %161 = vector.load %arg6[%c0_37, %c3968] : memref<8x4096xf32, #tpu.memory_space<vmem>>, vector<8x128xf32>
    %162 = vector.broadcast %160 : vector<8x1xf32> to vector<8x128xf32>
    %163 = arith.mulf %162, %161 : vector<8x128xf32>
    %164 = arith.addf %159, %163 : vector<8x128xf32>
    %165 = arith.truncf %0 : vector<8x33xf32> to vector<8x33xbf16>
    %c0_38 = arith.constant 0 : index
    %c0_39 = arith.constant 0 : index
    %166 = vector.load %arg3[%c0_38, %c0_39] : memref<33x128xbf16, #tpu.memory_space<vmem>>, vector<33x128xbf16>
    %cst_40 = arith.constant dense<0.000000e+00> : vector<8x128xf32>
    %167 = tpu.matmul %165, %166, %cst_40 {dimension_numbers = #tpu.dot_dimension_numbers<[1], [0], [0], [1], [0, 0, 1, 1], [], []>} : vector<8x33xbf16>, vector<33x128xbf16>, vector<8x128xf32> -> vector<8x128xf32>
    %168 = arith.addf %164, %167 : vector<8x128xf32>
    %169 = math.tanh %168 : vector<8x128xf32>
    %c0_41 = arith.constant 0 : index
    %c0_42 = arith.constant 0 : index
    %170 = vector.load %arg4[%c0_41, %c0_42] : memref<1x128xf32, #tpu.memory_space<vmem>>, vector<1x128xf32>
    %171 = vector.broadcast %170 : vector<1x128xf32> to vector<8x128xf32>
    %172 = arith.mulf %171, %169 : vector<8x128xf32>
    %173 = vector.extract_strided_slice %172 {offsets = [0, 0], sizes = [8, 32], strides = [1, 1]} : vector<8x128xf32> to vector<8x32xf32>
    %cst_43 = arith.constant dense<0.000000e+00> : vector<8xf32>
    %174 = vector.multi_reduction <add>, %173, %cst_43 [1] : vector<8x32xf32> to vector<8xf32>
    %175 = vector.shape_cast %174 : vector<8xf32> to vector<8x1xf32>
    %176 = vector.extract_strided_slice %172 {offsets = [0, 32], sizes = [8, 32], strides = [1, 1]} : vector<8x128xf32> to vector<8x32xf32>
    %cst_44 = arith.constant dense<0.000000e+00> : vector<8xf32>
    %177 = vector.multi_reduction <add>, %176, %cst_44 [1] : vector<8x32xf32> to vector<8xf32>
    %178 = vector.shape_cast %177 : vector<8xf32> to vector<8x1xf32>
    %179 = vector.extract_strided_slice %172 {offsets = [0, 64], sizes = [8, 32], strides = [1, 1]} : vector<8x128xf32> to vector<8x32xf32>
    %cst_45 = arith.constant dense<0.000000e+00> : vector<8xf32>
    %180 = vector.multi_reduction <add>, %179, %cst_45 [1] : vector<8x32xf32> to vector<8xf32>
    %181 = vector.shape_cast %180 : vector<8xf32> to vector<8x1xf32>
    %182 = vector.extract_strided_slice %172 {offsets = [0, 96], sizes = [8, 32], strides = [1, 1]} : vector<8x128xf32> to vector<8x32xf32>
    %cst_46 = arith.constant dense<0.000000e+00> : vector<8xf32>
    %183 = vector.multi_reduction <add>, %182, %cst_46 [1] : vector<8x32xf32> to vector<8xf32>
    %184 = vector.shape_cast %183 : vector<8xf32> to vector<8x1xf32>
    %185 = tpu.concatenate %175, %178, %181, %184 in 1 : vector<8x1xf32>, vector<8x1xf32>, vector<8x1xf32>, vector<8x1xf32> -> vector<8x4xf32>
    %186 = arith.negf %185 : vector<8x4xf32>
    %187 = math.exp %186 : vector<8x4xf32>
    %cst_47 = arith.constant 1.000000e+00 : f32
    %188 = vector.broadcast %cst_47 : f32 to vector<8x4xf32>
    %189 = arith.addf %188, %187 : vector<8x4xf32>
    %190 = arith.divf %188, %189 : vector<8x4xf32>
    %c0_48 = arith.constant 0 : index
    %c0_49 = arith.constant 0 : index
    %191 = vector.load %arg5[%c0_48, %c0_49] : memref<8x4xf32, #tpu.memory_space<vmem>>, vector<8x4xf32>
    tpu.vector_store %arg5[%c0_48, %c0_49], %190 {strides = array<i32>} : memref<8x4xf32, #tpu.memory_space<vmem>>, vector<8x4xf32>,
    return
  }
  func.func @transform_0(%arg0: i32) -> (i32, i32) {
    %c0_i32 = arith.constant 0 : i32
    %c0_i32_0 = arith.constant 0 : i32
    return %arg0, %c0_i32 : i32, i32
  }
  func.func @transform_1(%arg0: i32) -> (i32, i32) {
    %c0_i32 = arith.constant 0 : i32
    %c0_i32_0 = arith.constant 0 : i32
    %c0_i32_1 = arith.constant 0 : i32
    return %c0_i32, %c0_i32_0 : i32, i32
  }
  func.func @transform_2(%arg0: i32) -> (i32, i32) {
    %c0_i32 = arith.constant 0 : i32
    %c0_i32_0 = arith.constant 0 : i32
    %c0_i32_1 = arith.constant 0 : i32
    return %c0_i32, %c0_i32_0 : i32, i32
  }
  func.func @transform_3(%arg0: i32) -> (i32, i32) {
    %c0_i32 = arith.constant 0 : i32
    %c0_i32_0 = arith.constant 0 : i32
    %c0_i32_1 = arith.constant 0 : i32
    return %c0_i32, %c0_i32_0 : i32, i32
  }
  func.func @transform_4(%arg0: i32) -> (i32, i32) {
    %c0_i32 = arith.constant 0 : i32
    %c0_i32_0 = arith.constant 0 : i32
    return %arg0, %c0_i32 : i32, i32
  }
}

</mosaic_0001>

<bundles_post_ra>
// kernel: batched_fn.1
= control target key start
LH: loop header
LB: loop body
LE: loop exit
PB: predicated region body
PF: predicated region fallthrough
CT: control target
= control target key end

     0   :  { %v1618_v3 = vmov 0   ;;  %v1619_v9 = vmov 2   ;;  %v1620_v30 = vmov 3   ;;  %vm404_vm0 = vcmask 261120   ;;  %s1652_s16 = smov 64   ;;  %s1653_s17 = smov 96   ;;  %s2010_s1 = inlined_call_operand.vmem [shape: bf16[32,4096], index: 1, kind: input, shape index: {}]   ;;  %s2011_s0 = inlined_call_operand.vmem [shape: f32[8,33], index: 0, kind: input, shape index: {}]   ;;  %s2012_s2 = inlined_call_operand.vmem [shape: bf16[33,128], index: 2, kind: input, shape index: {}]   ;;  %s2013_s3 = inlined_call_operand.vmem [shape: f32[1,128], index: 3, kind: input, shape index: {}]   ;;  %s2014_s4 = inlined_call_operand.vmem [shape: f32[8,4], index: 4, kind: output, shape index: {}]  }
   0x1   :  { %v20_v0 = vld [vmem:[%s2010_s1] sm:$0xff]  ;;  %v22_v2 = vld [vmem:[%s2010_s1 + $0x10] sm:$0xff]  ;;  %440 = vmatprep.mubr.bf16.mxu1 %v1618_v3  ;;  %522 = vmatprep.mubr.bf16.mxu0 %v1618_v3  ;;  %v21_v17 = vld [vmem:[%s2010_s1 + $0x8] sm:$0xff]  ;;  %v1621_v37 = vmov 1   ;;  %v1622_v49 = vmov 4   ;;  %vm1343_vm1 = vcmask 1040384  }
   0x2   :  { %v36_v1 = vld [vmem:[%s2010_s1 + $0x80] sm:$0xff]  ;;  %v38_v5 = vld [vmem:[%s2010_s1 + $0x90] sm:$0xff]  ;;  %1578 = vset.pattern.permute.xlu1 %v1619_v9  ;;  %1576 = vset.pattern.permute.xlu0 %v1618_v3  ;;  %v37_v18 = vld [vmem:[%s2010_s1 + $0x88] sm:$0xff]  ;;  %vm1633_vm2 = vmmov 0   ;;  %vm1340_vm3 = vcmask 269312   ;;  %s1654_s18 = smov 32  }
   0x3   :  { %v1440_v4 = vcombine.high %v20_v0, %v36_v1  ;;  %v1439_v6 = vcombine.low %v20_v0, %v36_v1  ;;  %v52_v7 = vld [vmem:[%s2010_s1 + $0x100] sm:$0xff]  ;;  %v1444_v10 = vcombine.high %v22_v2, %v38_v5  ;;  %v1443_v11 = vcombine.low %v22_v2, %v38_v5  ;;  %v54_v13 = vld [vmem:[%s2010_s1 + $0x110] sm:$0xff]  ;;  %v53_v25 = vld [vmem:[%s2010_s1 + $0x108] sm:$0xff] }
   0x4   :  { %v68_v8 = vld [vmem:[%s2010_s1 + $0x180] sm:$0xff]  ;;  %v70_v14 = vld [vmem:[%s2010_s1 + $0x190] sm:$0xff]  ;;  %v1442_v23 = vcombine.high %v21_v17, %v37_v18  ;;  %v69_v26 = vld [vmem:[%s2010_s1 + $0x188] sm:$0xff]  ;;  %v1441_v31 = vcombine.low %v21_v17, %v37_v18  ;;  %v1623_v1 = vmov 6   ;;  %vm1421_vm4 = vcmask 7168  }
   0x5   :  { %v1472_v12 = vcombine.high %v52_v7, %v68_v8  ;;  %v1710_v15 = vld [vmem:[%s2011_s0] sm:$0xff]  ;;  %408 = vmatprep.subr.bf16.mxu1 %v1440_v4  ;;  %v1476_v16 = vcombine.high %v54_v13, %v70_v14  ;;  %490 = vmatprep.subr.bf16.mxu0 %v1444_v10  ;;  %v1471_v20 = vcombine.low %v52_v7, %v68_v8  ;;  %v23_v35 = vld [vmem:[%s2010_s1 + $0x18] sm:$0xff]  ;;  %v26_v38 = vld [vmem:[%s2010_s1 + $0x30] sm:$0xff]  ;;  %vm1423_vm5 = vcmask 15360  }
   0x6   :  { %v24_v19 = vld [vmem:[%s2010_s1 + $0x20] sm:$0xff]  ;;  %1112 = vperm.xlu1 %1578, %v1710_v15   ;;  %409 = vmatpush1.bf16.msra.mxu1 %v1439_v6  ;;  %v1475_v22 = vcombine.low %v54_v13, %v70_v14  ;;  %v1734_v27 = vpack.c.bf16 %v1710_v15, %v1710_v15  ;;  %v1474_v33 = vcombine.high %v53_v25, %v69_v26  ;;  %v39_v36 = vld [vmem:[%s2010_s1 + $0x98] sm:$0xff]  ;;  %v42_v39 = vld [vmem:[%s2010_s1 + $0xb0] sm:$0xff]  ;;  %vm1425_vm6 = vcmask 23552  }
   0x7   :  { %v40_v21 = vld [vmem:[%s2010_s1 + $0xa0] sm:$0xff]  ;;  %491 = vmatpush1.bf16.msra.mxu0 %v1443_v11  ;;  %410 = vmatprep.subr.bf16.mxu1 %v1472_v12  ;;  %v1473_v40 = vcombine.low %v53_v25, %v69_v26  ;;  %v1446_v42 = vcombine.high %v23_v35, %v39_v36  ;;  %v1452_v43 = vcombine.high %v26_v38, %v42_v39  ;;  %v55_v44 = vld [vmem:[%s2010_s1 + $0x118] sm:$0xff]  ;;  %v58_v46 = vld [vmem:[%s2010_s1 + $0x130] sm:$0xff]  ;;  %vm1433_vm7 = vcmask 31744  }
   0x8   :  { %492 = vmatprep.subr.bf16.mxu0 %v1476_v16  ;;  %v1448_v24 = vcombine.high %v24_v19, %v40_v21  ;;  %1099 = vperm.xlu0 %1576, %v1710_v15   ;;  %v56_v28 = vld [vmem:[%s2010_s1 + $0x120] sm:$0xff]  ;;  %v1447_v32 = vcombine.low %v24_v19, %v40_v21  ;;  %v71_v45 = vld [vmem:[%s2010_s1 + $0x198] sm:$0xff]  ;;  %v74_v47 = vld [vmem:[%s2010_s1 + $0x1b0] sm:$0xff]  ;;  %v1445_v48 = vcombine.low %v23_v35, %v39_v36 }
   0x9   :  { %v72_v29 = vld [vmem:[%s2010_s1 + $0x1a0] sm:$0xff]  ;;  %v1451_v50 = vcombine.low %v26_v38, %v42_v39  ;;  %v1478_v51 = vcombine.high %v55_v44, %v71_v45  ;;  %v1484_v52 = vcombine.high %v58_v46, %v74_v47  ;;  %v25_v53 = vld [vmem:[%s2010_s1 + $0x28] sm:$0xff]  ;;  %v1477_v57 = vcombine.low %v55_v44, %v71_v45  ;;  %v27_v7 = vld [vmem:[%s2010_s1 + $0x38] sm:$0xff] }
   0xa   :  { %1579 = vset.pattern.permute.xlu1 %v1620_v30  ;;  %411 = vmatpush1.bf16.msra.mxu1 %v1471_v20  ;;  %v1480_v34 = vcombine.high %v56_v28, %v72_v29  ;;  %v1479_v41 = vcombine.low %v56_v28, %v72_v29  ;;  %v41_v54 = vld [vmem:[%s2010_s1 + $0xa8] sm:$0xff]  ;;  %v28_v55 = vld [vmem:[%s2010_s1 + $0x40] sm:$0xff]  ;;  %v1483_v58 = vcombine.low %v58_v46, %v74_v47  ;;  %v43_v8 = vld [vmem:[%s2010_s1 + $0xb8] sm:$0xff]  ;;  %v1624_v20 = vmov 7  }
   0xb   :  { %1119 = vperm.xlu1 %1579, %v1710_v15   ;;  %493 = vmatpush1.bf16.msra.mxu0 %v1475_v22  ;;  %v44_v56 = vld [vmem:[%s2010_s1 + $0xc0] sm:$0xff]  ;;  %v1450_v59 = vcombine.high %v25_v53, %v41_v54  ;;  %v57_v60 = vld [vmem:[%s2010_s1 + $0x128] sm:$0xff]  ;;  %v1449_v2 = vcombine.low %v25_v53, %v41_v54  ;;  %v30_v9 = vld [vmem:[%s2010_s1 + $0x50] sm:$0xff]  ;;  %v1454_v13 = vcombine.high %v27_v7, %v43_v8  ;;  %v1625_v28 = vmov 5  }
   0xc   :  { %449 = vmatprep.subr.bf16.mxu1 %v1442_v23  ;;  %572 = vmatprep.subr.bf16.mxu0 %v1448_v24  ;;  %v1456_v61 = vcombine.high %v28_v55, %v44_v56  ;;  %v73_v62 = vld [vmem:[%s2010_s1 + $0x1a8] sm:$0xff]  ;;  %v60_v63 = vld [vmem:[%s2010_s1 + $0x140] sm:$0xff]  ;;  %v1455_v4 = vcombine.low %v28_v55, %v44_v56  ;;  %v46_v10 = vld [vmem:[%s2010_s1 + $0xd0] sm:$0xff]  ;;  %v1453_v21 = vcombine.low %v27_v7, %v43_v8  ;;  %v1626_v39 = vmov 9  }
   0xd   :  { %1577 = vset.pattern.permute.xlu0 %v1621_v37  ;;  %1503 = vmatmul.mubr.msk.bf16.vlgmr.msra.gmra.mrb[0].mxu1 %vm404_vm0, %v1734_v27  ;;  %v76_v0 = vld [vmem:[%s2010_s1 + $0x1c0] sm:$0xff]  ;;  %v1482_v5 = vcombine.high %v57_v60, %v73_v62  ;;  %v1481_v11 = vcombine.low %v57_v60, %v73_v62  ;;  %v1460_v14 = vcombine.high %v30_v9, %v46_v10  ;;  %v59_v16 = vld [vmem:[%s2010_s1 + $0x138] sm:$0xff]  ;;  %v62_v18 = vld [vmem:[%s2010_s1 + $0x150] sm:$0xff]  ;;  %v1627_v46 = vmov 8  }
   0xe   :  { %1505 = vmatmul.mubr.msk.bf16.vlgmr.msra.gmra.mrb[0].mxu0 %vm404_vm0, %v1734_v27  ;;  %450 = vmatpush1.bf16.msra.mxu1 %v1441_v31  ;;  %v1488_v6 = vcombine.high %v60_v63, %v76_v0  ;;  %v1487_v12 = vcombine.low %v60_v63, %v76_v0  ;;  %v75_v17 = vld [vmem:[%s2010_s1 + $0x1b8] sm:$0xff]  ;;  %v78_v19 = vld [vmem:[%s2010_s1 + $0x1d0] sm:$0xff]  ;;  %v1459_v22 = vcombine.low %v30_v9, %v46_v10  ;;  %v29_v25 = vld [vmem:[%s2010_s1 + $0x48] sm:$0xff]  ;;  %v1628_v55 = vmov 10  }
   0xf   :  { %573 = vmatpush1.bf16.msra.mxu0 %v1447_v32  ;;  %451 = vmatprep.subr.bf16.mxu1 %v1474_v33  ;;  %v1486_v23 = vcombine.high %v59_v16, %v75_v17  ;;  %v1492_v24 = vcombine.high %v62_v18, %v78_v19  ;;  %v45_v26 = vld [vmem:[%s2010_s1 + $0xc8] sm:$0xff]  ;;  %v32_v29 = vld [vmem:[%s2010_s1 + $0x60] sm:$0xff]  ;;  %v1485_v31 = vcombine.low %v59_v16, %v75_v17  ;;  %v31_v44 = vld [vmem:[%s2010_s1 + $0x58] sm:$0xff]  ;;  %v1629_v63 = vmov 11  }
  0x10   :  { %574 = vmatprep.subr.bf16.mxu0 %v1480_v34  ;;  %481 = vmatprep.mubr.bf16.mxu1 %v1618_v3  ;;  %v48_v30 = vld [vmem:[%s2010_s1 + $0xe0] sm:$0xff]  ;;  %v1491_v32 = vcombine.low %v62_v18, %v78_v19  ;;  %v1458_v33 = vcombine.high %v29_v25, %v45_v26  ;;  %v61_v35 = vld [vmem:[%s2010_s1 + $0x148] sm:$0xff]  ;;  %v47_v45 = vld [vmem:[%s2010_s1 + $0xd8] sm:$0xff]  ;;  %v1630_v7 = vmov 12   ;;  %v1631_v10 = vmov 14  }
  0x11   :  { %604 = vmatprep.mubr.bf16.mxu0 %v1618_v3  ;;  %1580 = vset.pattern.permute.xlu1 %v1622_v49  ;;  %v1464_v34 = vcombine.high %v32_v29, %v48_v30  ;;  %v77_v36 = vld [vmem:[%s2010_s1 + $0x1c8] sm:$0xff]  ;;  %v64_v37 = vld [vmem:[%s2010_s1 + $0x160] sm:$0xff]  ;;  %v34_v47 = vld [vmem:[%s2010_s1 + $0x70] sm:$0xff]  ;;  %v1461_v56 = vcombine.low %v31_v44, %v47_v45 }
  0x12   :  { %452 = vmatpush1.bf16.msra.mxu1 %v1473_v40  ;;  %1126 = vperm.xlu1 %1580, %v1710_v15   ;;  %v80_v38 = vld [vmem:[%s2010_s1 + $0x1e0] sm:$0xff]  ;;  %v1457_v40 = vcombine.low %v29_v25, %v45_v26  ;;  %v1489_v49 = vcombine.low %v61_v35, %v77_v36  ;;  %v79_v53 = vld [vmem:[%s2010_s1 + $0x1d8] sm:$0xff]  ;;  %v33_v60 = vld [vmem:[%s2010_s1 + $0x68] sm:$0xff]  ;;  %v1635_v26 = vmov 17  }
  0x13   :  { %575 = vmatpush1.bf16.msra.mxu0 %v1479_v41  ;;  %531 = vmatprep.subr.bf16.mxu1 %v1446_v42  ;;  %v1463_v41 = vcombine.low %v32_v29, %v48_v30  ;;  %v1490_v42 = vcombine.high %v61_v35, %v77_v36  ;;  %v67_v18 = vld [vmem:[%s2010_s1 + $0x178] sm:$0xff]  ;;  %v1636_v30 = vmov 15   ;;  %v1642_v35 = vmov 19  }
  0x14   :  { %654 = vmatprep.subr.bf16.mxu0 %v1452_v43  ;;  %1105 = vperm.xlu0 %1577, %v1710_v15   ;;  %v1496_v43 = vcombine.high %v64_v37, %v80_v38  ;;  %v83_v19 = vld [vmem:[%s2010_s1 + $0x1f8] sm:$0xff]  ;;  %v1643_v36 = vmov 29  }
  0x15   :  { %1504 = vmatmul.mubr.msk.bf16.vlgmr.msra.gmra.mrb[4].mxu1 %vm404_vm0, %v1734_v27  ;;  %v1502_v25 = vcombine.high %v67_v18, %v83_v19  ;;  %v1501_v29 = vcombine.low %v67_v18, %v83_v19 }
  0x16   :  { %1507 = vmatmul.mubr.msk.bf16.vlgmr.msra.gmra.mrb[4].mxu0 %vm404_vm0, %v1734_v27  ;;  %532 = vmatpush1.bf16.msra.mxu1 %v1445_v48  ;;  %v50_v48 = vld [vmem:[%s2010_s1 + $0xf0] sm:$0xff] }
  0x17   :  { %655 = vmatpush1.bf16.msra.mxu0 %v1451_v50  ;;  %533 = vmatprep.subr.bf16.mxu1 %v1478_v51  ;;  %v1495_v50 = vcombine.low %v64_v37, %v80_v38  ;;  %v1462_v51 = vcombine.high %v31_v44, %v47_v45  ;;  %v1468_v54 = vcombine.high %v34_v47, %v50_v48  ;;  %v1645_v37 = vmov 31  }
  0x18   :  { %656 = vmatprep.subr.bf16.mxu0 %v1484_v52  ;;  %563 = vmatprep.mubr.bf16.mxu1 %v1618_v3  ;;  %v63_v52 = vld [vmem:[%s2010_s1 + $0x158] sm:$0xff]  ;;  %v1467_v62 = vcombine.low %v34_v47, %v50_v48  ;;  %v1646_v38 = vmov 22  }
  0x19   :  { %686 = vmatprep.mubr.bf16.mxu0 %v1618_v3  ;;  %1582 = vset.pattern.permute.xlu1 %v1623_v1  ;;  %v1493_v1 = vcombine.low %v63_v52, %v79_v53 }
  0x1a   :  { %534 = vmatpush1.bf16.msra.mxu1 %v1477_v57  ;;  %1140 = vperm.xlu1 %1582, %v1710_v15   ;;  %v66_v57 = vld [vmem:[%s2010_s1 + $0x170] sm:$0xff] }
  0x1b   :  { %657 = vmatpush1.bf16.msra.mxu0 %v1483_v58  ;;  %613 = vmatprep.subr.bf16.mxu1 %v1450_v59  ;;  %v82_v58 = vld [vmem:[%s2010_s1 + $0x1f0] sm:$0xff]  ;;  %v1494_v59 = vcombine.high %v63_v52, %v79_v53 }
  0x1c   :  { %736 = vmatprep.subr.bf16.mxu0 %v1456_v61  ;;  %1581 = vset.pattern.permute.xlu0 %v1625_v28  ;;  %v49_v61 = vld [vmem:[%s2010_s1 + $0xe8] sm:$0xff]  ;;  %v1500_v0 = vcombine.high %v66_v57, %v82_v58 }
  0x1d   :  { %1506 = vmatmul.mubr.msk.bf16.vlgmr.msra.gmra.mrb[8].mxu1 %vm404_vm0, %v1734_v27  ;;  %1133 = vperm.xlu0 %1581, %v1710_v15   ;;  %v1465_v8 = vcombine.low %v33_v60, %v49_v61 }
  0x1e   :  { %1509 = vmatmul.mubr.msk.bf16.vlgmr.msra.gmra.mrb[8].mxu0 %vm404_vm0, %v1734_v27  ;;  %614 = vmatpush1.bf16.msra.mxu1 %v1449_v2  ;;  %v1466_v2 = vcombine.high %v33_v60, %v49_v61 }
  0x1f   :  { %737 = vmatpush1.bf16.msra.mxu0 %v1455_v4  ;;  %615 = vmatprep.subr.bf16.mxu1 %v1482_v5  ;;  %v65_v4 = vld [vmem:[%s2010_s1 + $0x168] sm:$0xff] }
  0x20   :  { %738 = vmatprep.subr.bf16.mxu0 %v1488_v6  ;;  %645 = vmatprep.mubr.bf16.mxu1 %v1618_v3  ;;  %v81_v5 = vld [vmem:[%s2010_s1 + $0x1e8] sm:$0xff]  ;;  %v1499_v6 = vcombine.low %v66_v57, %v82_v58 }
  0x21   :  { %768 = vmatprep.mubr.bf16.mxu0 %v1618_v3  ;;  %1583 = vset.pattern.permute.xlu1 %v1624_v20  ;;  %v1498_v9 = vcombine.high %v65_v4, %v81_v5  ;;  %v1497_v16 = vcombine.low %v65_v4, %v81_v5  ;;  %v1610_v20 = vld [vmem:[%s2012_s2 + $0x8] sm:$0xff]  }
  0x22   :  { %616 = vmatpush1.bf16.msra.mxu1 %v1481_v11  ;;  %1147 = vperm.xlu1 %1583, %v1710_v15   ;;  %v35_v11 = vld [vmem:[%s2010_s1 + $0x78] sm:$0xff] }
  0x23   :  { %739 = vmatpush1.bf16.msra.mxu0 %v1487_v12  ;;  %695 = vmatprep.subr.bf16.mxu1 %v1454_v13  ;;  %v51_v12 = vld [vmem:[%s2010_s1 + $0xf8] sm:$0xff]  ;;  %v1609_v13 = vld [vmem:[%s2012_s2] sm:$0xff]  }
  0x24   :  { %818 = vmatprep.subr.bf16.mxu0 %v1460_v14  ;;  %1584 = vset.pattern.permute.xlu0 %v1627_v46  ;;  %v1632_v14 = vmov 0.0   ;;  %v1470_v17 = vcombine.high %v35_v11, %v51_v12 }
  0x25   :  { %1508 = vmatmul.mubr.msk.bf16.vlgmr.msra.gmra.mrb[12].mxu1 %vm404_vm0, %v1734_v27  ;;  %1154 = vperm.xlu0 %1584, %v1710_v15  }
  0x26   :  { %1511 = vmatmul.mubr.msk.bf16.vlgmr.msra.gmra.mrb[12].mxu0 %vm404_vm0, %v1734_v27  ;;  %696 = vmatpush1.bf16.msra.mxu1 %v1453_v21  ;;  %v1611_v21 = vld [vmem:[%s2012_s2 + $0x10] ss:$0 sps:$4 sm:$0x11]  }
  0x27   :  { %819 = vmatpush1.bf16.msra.mxu0 %v1459_v22  ;;  %697 = vmatprep.subr.bf16.mxu1 %v1486_v23  ;;  %v1345_v22 = vsel %vm1343_vm1, 65535, %v1618_v3  ;;  %v1634_v23 = vmov 13  }
  0x28   :  { %820 = vmatprep.subr.bf16.mxu0 %v1492_v24  ;;  %727 = vmatprep.mubr.bf16.mxu1 %v1618_v3  ;;  %v1469_v24 = vcombine.low %v35_v11, %v51_v12  ;;  %v1347_v28 = vand.u32 %v1611_v21, %v1345_v22 }
  0x29   :  { %850 = vmatprep.mubr.bf16.mxu0 %v1618_v3  ;;  %1585 = vset.pattern.permute.xlu1 %v1626_v39  ;;  %v1647_v39 = vmov 24  }
  0x2a   :  { %698 = vmatpush1.bf16.msra.mxu1 %v1485_v31  ;;  %1161 = vperm.xlu1 %1585, %v1710_v15   ;;  %v1637_v31 = vmov 20  }
  0x2b   :  { %821 = vmatpush1.bf16.msra.mxu0 %v1491_v32  ;;  %777 = vmatprep.subr.bf16.mxu1 %v1458_v33  ;;  %v1638_v32 = vmov 16   ;;  %v1640_v33 = vmov 18  }
  0x2c   :  { %900 = vmatprep.subr.bf16.mxu0 %v1464_v34  ;;  %1587 = vset.pattern.permute.xlu0 %v1629_v63  ;;  %v1641_v34 = vmov 26  }
  0x2d   :  { %1510 = vmatmul.mubr.msk.bf16.vlgmr.msra.gmra.mrb[16].mxu1 %vm404_vm0, %v1734_v27  ;;  %1175 = vperm.xlu0 %1587, %v1710_v15  }
  0x2e   :  { %1513 = vmatmul.mubr.msk.bf16.vlgmr.msra.gmra.mrb[16].mxu0 %vm404_vm0, %v1734_v27  ;;  %778 = vmatpush1.bf16.msra.mxu1 %v1457_v40  ;;  %v1648_v40 = vmov 25  }
  0x2f   :  { %901 = vmatpush1.bf16.msra.mxu0 %v1463_v41  ;;  %779 = vmatprep.subr.bf16.mxu1 %v1490_v42  ;;  %v1649_v41 = vmov 27   ;;  %v1650_v42 = vmov 28  }
  0x30   :  { %902 = vmatprep.subr.bf16.mxu0 %v1496_v43  ;;  %809 = vmatprep.mubr.bf16.mxu1 %v1618_v3  ;;  %v1651_v43 = vmov 30  }
  0x31   :  { %932 = vmatprep.mubr.bf16.mxu0 %v1618_v3  ;;  %1586 = vset.pattern.permute.xlu1 %v1628_v55 }
  0x32   :  { %780 = vmatpush1.bf16.msra.mxu1 %v1489_v49  ;;  %1168 = vperm.xlu1 %1586, %v1710_v15  }
  0x33   :  { %903 = vmatpush1.bf16.msra.mxu0 %v1495_v50  ;;  %859 = vmatprep.subr.bf16.mxu1 %v1462_v51 }
  0x34   :  { %982 = vmatprep.subr.bf16.mxu0 %v1468_v54  ;;  %1590 = vset.pattern.permute.xlu0 %v1631_v10 }
  0x35   :  { %1512 = vmatmul.mubr.msk.bf16.vlgmr.msra.gmra.mrb[20].mxu1 %vm404_vm0, %v1734_v27  ;;  %1196 = vperm.xlu0 %1590, %v1710_v15  }
  0x36   :  { %860 = vmatpush1.bf16.msra.mxu1 %v1461_v56  ;;  %1515 = vmatmul.mubr.msk.bf16.vlgmr.msra.gmra.mrb[20].mxu0 %vm404_vm0, %v1734_v27 }
  0x37   :  { %861 = vmatprep.subr.bf16.mxu1 %v1494_v59  ;;  %891 = vmatprep.mubr.bf16.mxu1 %v1618_v3 }
  0x38   :  { %983 = vmatpush1.bf16.msra.mxu0 %v1467_v62  ;;  %1014 = vmatprep.mubr.bf16.mxu0 %v1618_v3 }
  0x39   :  { %984 = vmatprep.subr.bf16.mxu0 %v1500_v0  ;;  %1588 = vset.pattern.permute.xlu1 %v1630_v7 }
  0x3a   :  { %862 = vmatpush1.bf16.msra.mxu1 %v1493_v1  ;;  %1182 = vperm.xlu1 %1588, %v1710_v15  }
  0x3b   :  { %941 = vmatprep.subr.bf16.mxu1 %v1466_v2  ;;  %1593 = vset.pattern.permute.xlu0 %v1635_v26 }
  0x3c   :  { %985 = vmatpush1.bf16.msra.mxu0 %v1499_v6  ;;  %1217 = vperm.xlu0 %1593, %v1710_v15  }
  0x3d   :  { %1514 = vmatmul.mubr.msk.bf16.vlgmr.msra.gmra.mrb[24].mxu1 %vm404_vm0, %v1734_v27  ;;  %1529 = vmatprep.subr.bf16.mxu0 %v1632_v14 }
  0x3e   :  { %942 = vmatpush1.bf16.msra.mxu1 %v1465_v8  ;;  %973 = vmatprep.mubr.bf16.mxu1 %v1618_v3 }
  0x3f   :  { %943 = vmatprep.subr.bf16.mxu1 %v1498_v9  ;;  %1517 = vmatmul.mubr.msk.bf16.vlgmr.msra.gmra.mrb[24].mxu0 %vm404_vm0, %v1734_v27 }
  0x40   :  { %1530 = vmatpush3.bf16.msra.mxu0 %v1609_v13  ;;  %1535 = vmatprep.mubr.msk.bf16.mxu0 %vm1633_vm2, %v1632_v14 }
  0x41   :  { %1531 = vmatprep.subr.bf16.mxu0 %v1632_v14  ;;  %1589 = vset.pattern.permute.xlu1 %v1634_v23 }
  0x42   :  { %944 = vmatpush1.bf16.msra.mxu1 %v1497_v16  ;;  %1189 = vperm.xlu1 %1589, %v1710_v15  }
  0x43   :  { %1023 = vmatprep.subr.bf16.mxu1 %v1470_v17  ;;  %1596 = vset.pattern.permute.xlu0 %v1637_v31 }
  0x44   :  { %1532 = vmatpush3.bf16.msra.mxu0 %v1610_v20  ;;  %1238 = vperm.xlu0 %1596, %v1710_v15  }
  0x45   :  { %1516 = vmatmul.mubr.msk.bf16.vlgmr.msra.gmra.mrb[28].mxu1 %vm404_vm0, %v1734_v27  ;;  %1533 = vmatprep.subr.bf16.mxu0 %v1632_v14 }
  0x46   :  { %1024 = vmatpush1.bf16.msra.mxu1 %v1469_v24  ;;  %1055 = vmatprep.mubr.bf16.mxu1 %v1618_v3  ;;  %v1639_v3 = vmov 23  }
  0x47   :  { %1025 = vmatprep.subr.bf16.mxu1 %v1502_v25  ;;  %1591 = vset.pattern.permute.xlu1 %v1636_v30 }
  0x48   :  { %1534 = vmatpush3.bf16.msra.mxu0 %v1347_v28  ;;  %1203 = vperm.xlu1 %1591, %v1710_v15  }
  0x49   :  { %1599 = vset.pattern.permute.xlu0 %v1639_v3 }
  0x4a   :  { %1026 = vmatpush1.bf16.msra.mxu1 %v1501_v29  ;;  %1259 = vperm.xlu0 %1599, %v1710_v15  }
  0x4b   :  { %1536 = vmatmul.mubr.msk.bf16.vlgmr.msra.gmra.mrb[28].mxu0 %vm1340_vm3, %v1734_v27 }
  0x4c   :  { %1592 = vset.pattern.permute.xlu1 %v1638_v32 }
  0x4d   :  { %1518 = vmatmul.mubr.msk.bf16.vlgmr.msra.gmra.mrb[32].mxu1 %vm404_vm0, %v1734_v27  ;;  %1210 = vperm.xlu1 %1592, %v1710_v15   ;;  %v1644_v27 = vmov 21  }
  0x4e   :  { %1602 = vset.pattern.permute.xlu0 %v1641_v34 }
  0x4f   :  { %1280 = vperm.xlu0 %1602, %v1710_v15  }
  0x51   :  { %1594 = vset.pattern.permute.xlu1 %v1640_v33 }
  0x52   :  { %1224 = vperm.xlu1 %1594, %v1710_v15  }
  0x53   :  { %1605 = vset.pattern.permute.xlu0 %v1643_v36 }
  0x54   :  { %1301 = vperm.xlu0 %1605, %v1710_v15  }
  0x56   :  { %1595 = vset.pattern.permute.xlu1 %v1642_v35 }
  0x57   :  { %1231 = vperm.xlu1 %1595, %v1710_v15  }
  0x58   :  { %1608 = vset.pattern.permute.xlu0 %v1645_v37 }
  0x5b   :  { %1597 = vset.pattern.permute.xlu1 %v1644_v27 }
  0x5c   :  { %1245 = vperm.xlu1 %1597, %v1710_v15  }
  0x60   :  { %1598 = vset.pattern.permute.xlu1 %v1646_v38 }
  0x61   :  { %1252 = vperm.xlu1 %1598, %v1710_v15  }
  0x65   :  { %1600 = vset.pattern.permute.xlu1 %v1647_v39 }
  0x66   :  { %1266 = vperm.xlu1 %1600, %v1710_v15  }
  0x6a   :  { %1601 = vset.pattern.permute.xlu1 %v1648_v40 }
  0x6b   :  { %1273 = vperm.xlu1 %1601, %v1710_v15  }
  0x6f   :  { %1603 = vset.pattern.permute.xlu1 %v1649_v41 }
  0x70   :  { %1287 = vperm.xlu1 %1603, %v1710_v15  }
  0x74   :  { %1604 = vset.pattern.permute.xlu1 %v1650_v42 }
  0x75   :  { %1294 = vperm.xlu1 %1604, %v1710_v15  }
  0x79   :  { %1606 = vset.pattern.permute.xlu1 %v1651_v43 }
  0x7a   :  { %1308 = vperm.xlu1 %1606, %v1710_v15  }
  0x7e   :  { %1607 = vset.pattern.permute.xlu1 %v1645_v37 }
  0x7f   :  { %1315 = vperm.xlu1 %1607, %v1710_v15  }
  0x85   :  { %v1113_v44 = vpop.permute.xlu1 %1112 }
  0x87   :  { %v1100_v55 = vpop.permute.xlu0 %1099 }
  0x8a   :  { %v1120_v45 = vpop.permute.xlu1 %1119 }
  0x91   :  { %v1127_v46 = vpop.permute.xlu1 %1126 }
  0x93   :  { %v1106_v57 = vpop.permute.xlu0 %1105 }
  0x99   :  { %v1141_v47 = vpop.permute.xlu1 %1140 }
  0x9c   :  { %v1134_v15 = vpop.permute.xlu0 %1133 }
  0xa1   :  { %v1148_v48 = vpop.permute.xlu1 %1147 }
  0xa4   :  { %v1155_v7 = vpop.permute.xlu0 %1154 }
  0xa9   :  { %v1162_v49 = vpop.permute.xlu1 %1161 }
  0xac   :  { %v1176_v25 = vpop.permute.xlu0 %1175 }
  0xb1   :  { %v1169_v50 = vpop.permute.xlu1 %1168 }
  0xb4   :  { %v1197_v42 = vpop.permute.xlu0 %1196 }
  0xb9   :  { %v1973_v51 = vpop.permute.xlu1 %1182 }
  0xc1   :  { %v1975_v52 = vpop.permute.xlu1 %1189 }
  0xc7   :  { %v1977_v53 = vpop.permute.xlu1 %1203 }
  0xcc   :  { %v1979_v54 = vpop.permute.xlu1 %1210 }
  0xd1   :  { %v1981_v56 = vpop.permute.xlu1 %1224 }
  0xd6   :  { %v1983_v59 = vpop.permute.xlu1 %1231 }
  0xdb   :  { %v1985_v9 = vpop.permute.xlu1 %1245 }
  0xe0   :  { %v442_v58 = vpop.f32.mrb[0].mxu1  ;;  %v1987_v28 = vpop.permute.xlu1 %1252 }
  0xe1   :  { %v1102_v60 = vmul.f32 %v1100_v55, %v442_v58  ;;  %v524_v61 = vpop.f32.mrb[0].mxu0  ;;  %v444_v62 = vpop.f32.mrb[1].mxu1 }
  0xe2   :  { %v1108_v63 = vmul.f32 %v1106_v57, %v444_v62  ;;  %v446_v0 = vpop.f32.mrb[2].mxu1  ;;  %v526_v1 = vpop.f32.mrb[1].mxu0  ;;  %v1129_v21 = vmul.f32 %v1127_v46, %v524_v61 }
  0xe3   :  { %v447_v2 = vpop.f32.mrb[3].mxu1  ;;  %v528_v4 = vpop.f32.mrb[2].mxu0  ;;  %v1136_v24 = vmul.f32 %v1134_v15, %v526_v1 }
  0xe4   :  { %v1109_v5 = vadd.f32 %v1108_v63, %v1102_v60  ;;  %v529_v6 = vpop.f32.mrb[3].mxu0  ;;  %v1218_v2 = vpop.permute.xlu0 %1217 }
  0xe8   :  { %v483_v8 = vpop.f32.mrb[4].mxu1 }
  0xe9   :  { %v1115_v10 = vmul.f32 %v1113_v44, %v483_v8  ;;  %v606_v11 = vpop.f32.mrb[4].mxu0  ;;  %v485_v12 = vpop.f32.mrb[5].mxu1 }
  0xea   :  { %v1122_v13 = vmul.f32 %v1120_v45, %v485_v12  ;;  %v608_v14 = vpop.f32.mrb[5].mxu0  ;;  %v487_v16 = vpop.f32.mrb[6].mxu1  ;;  %v1157_v27 = vmul.f32 %v1155_v7, %v606_v11 }
  0xeb   :  { %v1116_v17 = vadd.f32 %v1115_v10, %v1109_v5  ;;  %v488_v18 = vpop.f32.mrb[7].mxu1  ;;  %v610_v19 = vpop.f32.mrb[6].mxu0  ;;  %v1164_v40 = vmul.f32 %v1162_v49, %v608_v14 }
  0xec   :  { %v611_v20 = vpop.f32.mrb[7].mxu0  ;;  %v1989_v44 = vpop.permute.xlu1 %1266 }
  0xed   :  { %v1123_v22 = vadd.f32 %v1122_v13, %v1116_v17  ;;  %v1239_v20 = vpop.permute.xlu0 %1238 }
  0xef   :  { %v1130_v23 = vadd.f32 %v1129_v21, %v1123_v22 }
  0xf0   :  { %v565_v26 = vpop.f32.mrb[8].mxu1  ;;  %v1274_v5 = vpop.permute.xlu1 %1273 }
  0xf1   :  { %v1137_v29 = vadd.f32 %v1136_v24, %v1130_v23  ;;  %v1143_v30 = vmul.f32 %v1141_v47, %v565_v26  ;;  %v688_v31 = vpop.f32.mrb[8].mxu0  ;;  %v567_v32 = vpop.f32.mrb[9].mxu1 }
  0xf2   :  { %v1150_v3 = vmul.f32 %v1148_v48, %v567_v32  ;;  %v690_v33 = vpop.f32.mrb[9].mxu0  ;;  %v569_v34 = vpop.f32.mrb[10].mxu1  ;;  %v1185_v63 = vmul.f32 %v1973_v51, %v688_v31 }
  0xf3   :  { %v1144_v35 = vadd.f32 %v1143_v30, %v1137_v29  ;;  %v570_v36 = vpop.f32.mrb[11].mxu1  ;;  %v692_v37 = vpop.f32.mrb[10].mxu0  ;;  %v1192_v49 = vmul.f32 %v1975_v52, %v690_v33 }
  0xf4   :  { %v693_v38 = vpop.f32.mrb[11].mxu0  ;;  %v1288_v22 = vpop.permute.xlu1 %1287 }
  0xf5   :  { %v1151_v39 = vadd.f32 %v1150_v3, %v1144_v35 }
  0xf7   :  { %v1158_v41 = vadd.f32 %v1157_v27, %v1151_v39  ;;  %v1260_v27 = vpop.permute.xlu0 %1259 }
  0xf8   :  { %v647_v43 = vpop.f32.mrb[12].mxu1 }
  0xf9   :  { %v1165_v45 = vadd.f32 %v1164_v40, %v1158_v41  ;;  %v1171_v46 = vmul.f32 %v1169_v50, %v647_v43  ;;  %v770_v47 = vpop.f32.mrb[12].mxu0  ;;  %v649_v55 = vpop.f32.mrb[13].mxu1 }
  0xfa   :  { %v1178_v57 = vmul.f32 %v1176_v25, %v649_v55  ;;  %v651_v48 = vpop.f32.mrb[14].mxu1  ;;  %v772_v15 = vpop.f32.mrb[13].mxu0  ;;  %v1213_v51 = vmul.f32 %v1979_v54, %v770_v47 }
  0xfb   :  { %v1172_v58 = vadd.f32 %v1171_v46, %v1165_v45  ;;  %v652_v60 = vpop.f32.mrb[15].mxu1  ;;  %v774_v61 = vpop.f32.mrb[14].mxu0  ;;  %v1220_v19 = vmul.f32 %v1218_v2, %v772_v15 }
  0xfc   :  { %v775_v62 = vpop.f32.mrb[15].mxu0  ;;  %v1295_v40 = vpop.permute.xlu1 %1294 }
  0xfd   :  { %v1179_v0 = vadd.f32 %v1178_v57, %v1172_v58 }
  0xff   :  { %v1186_v1 = vadd.f32 %v1185_v63, %v1179_v0 }
 0x100   :  { %v729_v4 = vpop.f32.mrb[16].mxu1  ;;  %v1309_v63 = vpop.permute.xlu1 %1308 }
 0x101   :  { %v1193_v6 = vadd.f32 %v1192_v49, %v1186_v1  ;;  %v1199_v50 = vmul.f32 %v1197_v42, %v729_v4  ;;  %v852_v7 = vpop.f32.mrb[16].mxu0  ;;  %v731_v8 = vpop.f32.mrb[17].mxu1 }
 0x102   :  { %v1206_v10 = vmul.f32 %v1977_v53, %v731_v8  ;;  %v854_v11 = vpop.f32.mrb[17].mxu0  ;;  %v733_v12 = vpop.f32.mrb[18].mxu1  ;;  %v1241_v3 = vmul.f32 %v1239_v20, %v852_v7 }
 0x103   :  { %v1200_v13 = vadd.f32 %v1199_v50, %v1193_v6  ;;  %v734_v14 = vpop.f32.mrb[19].mxu1  ;;  %v856_v16 = vpop.f32.mrb[18].mxu0  ;;  %v1248_v35 = vmul.f32 %v1985_v9, %v854_v11 }
 0x104   :  { %v857_v17 = vpop.f32.mrb[19].mxu0  ;;  %v1281_v9 = vpop.permute.xlu0 %1280 }
 0x105   :  { %v1207_v18 = vadd.f32 %v1206_v10, %v1200_v13  ;;  %v1316_v10 = vpop.permute.xlu1 %1315 }
 0x107   :  { %v1214_v52 = vadd.f32 %v1213_v51, %v1207_v18 }
 0x108   :  { %v811_v21 = vpop.f32.mrb[20].mxu1  ;;  %v1302_v4 = vpop.permute.xlu0 %1301 }
 0x109   :  { %v1221_v23 = vadd.f32 %v1220_v19, %v1214_v52  ;;  %v1227_v24 = vmul.f32 %v1981_v56, %v811_v21  ;;  %v813_v25 = vpop.f32.mrb[21].mxu1  ;;  %v934_v26 = vpop.f32.mrb[20].mxu0 }
 0x10a   :  { %v1234_v53 = vmul.f32 %v1983_v59, %v813_v25  ;;  %v815_v29 = vpop.f32.mrb[22].mxu1  ;;  %v936_v30 = vpop.f32.mrb[21].mxu0  ;;  %v1269_v55 = vmul.f32 %v1989_v44, %v934_v26 }
 0x10b   :  { %v1228_v31 = vadd.f32 %v1227_v24, %v1221_v23  ;;  %v816_v32 = vpop.f32.mrb[23].mxu1  ;;  %v938_v33 = vpop.f32.mrb[22].mxu0  ;;  %v1276_v15 = vmul.f32 %v1274_v5, %v936_v30 }
 0x10c   :  { %v939_v54 = vpop.f32.mrb[23].mxu0 }
 0x10d   :  { %v1235_v34 = vadd.f32 %v1234_v53, %v1228_v31 }
 0x10f   :  { %v1242_v36 = vadd.f32 %v1241_v3, %v1235_v34 }
 0x110   :  { %v893_v37 = vpop.f32.mrb[24].mxu1 }
 0x111   :  { %v1249_v38 = vadd.f32 %v1248_v35, %v1242_v36  ;;  %v1255_v56 = vmul.f32 %v1987_v28, %v893_v37  ;;  %v895_v39 = vpop.f32.mrb[25].mxu1 }
 0x112   :  { %v1262_v41 = vmul.f32 %v1260_v27, %v895_v39  ;;  %v897_v59 = vpop.f32.mrb[26].mxu1  ;;  %v1016_v42 = vpop.f32.mrb[24].mxu0 }
 0x113   :  { %v1256_v43 = vadd.f32 %v1255_v56, %v1249_v38  ;;  %v898_v45 = vpop.f32.mrb[27].mxu1  ;;  %v1018_v46 = vpop.f32.mrb[25].mxu0  ;;  %v1297_v50 = vmul.f32 %v1295_v40, %v1016_v42 }
 0x114   :  { %v1020_v47 = vpop.f32.mrb[26].mxu0  ;;  %v1304_v44 = vmul.f32 %v1302_v4, %v1018_v46 }
 0x115   :  { %v1263_v57 = vadd.f32 %v1262_v41, %v1256_v43  ;;  %v1021_v48 = vpop.f32.mrb[27].mxu0 }
 0x117   :  { %v1270_v58 = vadd.f32 %v1269_v55, %v1263_v57 }
 0x118   :  { %v975_v60 = vpop.f32.mrb[28].mxu1 }
 0x119   :  { %v1277_v61 = vadd.f32 %v1276_v15, %v1270_v58  ;;  %v1283_v62 = vmul.f32 %v1281_v9, %v975_v60  ;;  %v977_v28 = vpop.f32.mrb[29].mxu1 }
 0x11a   :  { %v1290_v0 = vmul.f32 %v1288_v22, %v977_v28  ;;  %v979_v49 = vpop.f32.mrb[30].mxu1  ;;  %v1523_v22 = vld [vmem:[%s2013_s3] ss:$0 sm:$0xff] }
 0x11b   :  { %v1284_v1 = vadd.f32 %v1283_v62, %v1277_v61  ;;  %v980_v2 = vpop.f32.mrb[31].mxu1 }
 0x11d   :  { %v1291_v6 = vadd.f32 %v1290_v0, %v1284_v1 }
 0x11e   :  { %v1383_v7 = vpop.f32.mrb[28].mxu0 }
 0x11f   :  { %v1298_v8 = vadd.f32 %v1297_v50, %v1291_v6  ;;  %v1537_v11 = vpop.f32.mrb[29].mxu0 }
 0x120   :  { %v1057_v12 = vpop.f32.mrb[32].mxu1  ;;  %v1386_v5 = vpop.f32.mrb[30].mxu0 }
 0x121   :  { %v1305_v13 = vadd.f32 %v1304_v44, %v1298_v8  ;;  %v1311_v14 = vmul.f32 %v1309_v63, %v1057_v12  ;;  %v1059_v16 = vpop.f32.mrb[33].mxu1  ;;  %v1538_v17 = vpop.f32.mrb[31].mxu0 }
 0x122   :  { %v1318_v51 = vmul.f32 %v1316_v10, %v1059_v16  ;;  %v1061_v18 = vpop.f32.mrb[34].mxu1 }
 0x123   :  { %v1312_v52 = vadd.f32 %v1311_v14, %v1305_v13  ;;  %v1062_v19 = vpop.f32.mrb[35].mxu1 }
 0x125   :  { %v1319_v20 = vadd.f32 %v1318_v51, %v1312_v52 }
 0x127   :  { %v1389_v21 = vadd.f32 %v1383_v7, %v1319_v20 }
 0x129   :  { %1612 = vtanh.f32 %v1389_v21 }
 0x133   :  { %v1613_v23 = vpop.eup %1612 }
 0x134   :  { %v1398_v24 = vmul.f32 %v1613_v23, %v1523_v22 }
 0x136   :  { %1409 = vrot.lane.b32.xlu1 %v1398_v24, %s1652_s16  ;;  %1403 = vrot.lane.b32.xlu0 %v1398_v24, %s1653_s17  ;;  %v1399_v25 = vsel %vm404_vm0, %v1398_v24, 0.0 }
 0x13a   :  { %1415 = vrot.lane.b32.xlu0 %v1398_v24, %s1654_s18 }
 0x15a   :  { %1400 = vadd.xlane.f32.xlu1 %v1399_v25 }
 0x1a8   :  { %v1404_v26 = vpop.permute.xlu0 %1403  ;;  %v1410_v29 = vpop.permute.xlu1 %1409 }
 0x1a9   :  { %v1406_v53 = vsel %vm404_vm0, %v1404_v26, 0.0  ;;  %v1412_v31 = vsel %vm404_vm0, %v1410_v29, 0.0 }
 0x1aa   :  { %1407 = vadd.xlane.f32.xlu0 %v1406_v53 }
 0x1ac   :  { %v1416_v30 = vpop.permute.xlu0 %1415 }
 0x1ad   :  { %v1418_v32 = vsel %vm404_vm0, %v1416_v30, 0.0 }
 0x1ae   :  { %1413 = vadd.xlane.f32.xlu0 %v1412_v31  ;;  %1419 = vadd.xlane.f32.xlu1 %v1418_v32 }
 0x1e7   :  { %v1401_v3 = vpop.xlane.xlu1 %1400 }
 0x237   :  { %v1408_v33 = vpop.xlane.xlu0 %1407 }
 0x238   :  { %v1422_v54 = vsel %vm1421_vm4, %v1401_v3, %v1408_v33 }
 0x23b   :  { %v1414_v34 = vpop.xlane.xlu0 %1413  ;;  %v1420_v35 = vpop.xlane.xlu1 %1419 }
 0x23c   :  { %v1424_v36 = vsel %vm1423_vm5, %v1422_v54, %v1414_v34 }
 0x23d   :  { %v1426_v27 = vsel %vm1425_vm6, %v1424_v36, %v1420_v35 }
 0x23e   :  { %v1524_v37 = vmul.f32 -1.442695, %v1426_v27 }
 0x240   :  { %1614 = vpow2.f32 %v1524_v37 }
 0x24a   :  { %v1615_v38 = vpop.eup %1614 }
 0x24b   :  { %v1430_v56 = vadd.f32 1.0, %v1615_v38 }
 0x24d   :  { %1616 = vrcp.f32 %v1430_v56 }
 0x257   :  { %v1617_v39 = vpop.eup %1616 }
 0x258   :  { %1434 = vst.msk [vmem:[%s2014_s4] sm:$0xff] %vm1433_vm7, %v1617_v39 }

</bundles_post_ra>
